<compile_context>
chip_gen: v5e
topology: v5e:2x2
jax: 0.10.0
libtpu: 0.0.40
codegen_flags: <defaults>
</compile_context>

<pallas_src>
import jax
import jax.numpy as jnp
from jax.experimental import pallas as pl
from jax.experimental.pallas import tpu as pltpu

_LANE = 128
_MIB = 1 << 20
# Conservative cross-generation budgets (v7x: 64 MiB physical VMEM, leave
# headroom for A double-buffers, accumulator and output buffers).
_RESIDENT_RHS_BUDGET = 24 * _MIB
_VMEM_LIMIT_CAP = 56 * _MIB


# ----------------------------- helpers --------------------------------------
def _round_up(x, m):
    return (x + m - 1) // m * m


def _choose_tiles(n):
    """Return (n_pad, tm, tk): padded node count, row tile, reduction tile."""
    n_pad = _round_up(n, _LANE)
    if n_pad <= 1024:
        # Whole reduction dim in one step; keep >= 2 row tiles when possible
        # so the "parallel" row axis shards across v7x's two TensorCores.
        tk = n_pad
        tm = n_pad
        for cand in (512, 256, 128):
            if n_pad % cand == 0 and n_pad // cand >= 2:
                tm = cand
                break
        return n_pad, tm, tk
    # Large graphs: big tiles so per-step compute/DMA dominates the ~0.35 us
    # per-grid-step overhead (512+ wide tiles reach ~85% of HBM roofline).
    n_pad = _round_up(n, 512)
    tm = 512
    tk = 512
    for cand in (2048, 1024):
        if n_pad % cand == 0:
            tk = cand
            break
    return n_pad, tm, tk


# ------------- optional standalone X @ W (only for very wide features) -------
def _xw_kernel(x_ref, w_ref, o_ref):
    o_ref[...] = jnp.dot(
        x_ref[...], w_ref[...], preferred_element_type=jnp.float32
    ).astype(o_ref.dtype)


def _feature_transform(x, w):
    """x: [n_pad, k] bf16, w: [k, f] bf16 -> [n_pad, f] bf16 (big row tiles)."""
    n_pad, k = x.shape
    f = w.shape[1]
    tm = n_pad
    for cand in (1024, 512, 256, 128):
        if n_pad % cand == 0 and n_pad // cand >= 2:
            tm = cand
            break
    return pl.pallas_call(
        _xw_kernel,
        out_shape=jax.ShapeDtypeStruct((n_pad, f), x.dtype),
        grid_spec=pltpu.PrefetchScalarGridSpec(
            num_scalar_prefetch=0,
            grid=(n_pad // tm,),
            in_specs=[
                pl.BlockSpec((tm, k), lambda i: (i, 0)),
                pl.BlockSpec((k, f), lambda i: (0, 0)),   # resident weight
            ],
            out_specs=pl.BlockSpec((tm, f), lambda i: (i, 0)),
        ),
        compiler_params=pltpu.CompilerParams(dimension_semantics=("parallel",)),
        cost_estimate=pl.CostEstimate(
            flops=2 * n_pad * k * f,
            transcendentals=0,
            bytes_accessed=2 * (n_pad * k + k * f + n_pad * f),
        ),
    )(x, w)


# --------------------- fused aggregation kernel factory ----------------------
def _make_agg_kernel(*, mode, valid_cols, has_w_in, has_w_out, rhs_resident, tk):
    def kernel(*refs):
        idx = 0
        a_ref = refs[idx]; idx += 1
        rhs_ref = refs[idx]; idx += 1
        w_in_ref = None
        if has_w_in:
            w_in_ref = refs[idx]; idx += 1
        b_ref = refs[idx]; idx += 1
        w_out_ref = None
        if has_w_out:
            w_out_ref = refs[idx]; idx += 1
        o_ref = refs[idx]; idx += 1
        acc_ref = refs[idx]

        k = pl.program_id(1)

        @pl.when(k == 0)
        def _():
            acc_ref[...] = jnp.zeros_like(acc_ref)

        if rhs_resident:
            # RHS DMA'd once (constant index_map); slice the k-tile in VMEM.
            off = pl.multiple_of(k * tk, tk)
            rhs_tile = rhs_ref[pl.ds(off, tk), :]
        else:
            rhs_tile = rhs_ref[...]

        if has_w_in:
            # Fused X @ W1 for this reduction tile (recompute per row tile is
            # free while the kernel is HBM-bound on streaming A).
            rhs_tile = jnp.dot(
                rhs_tile, w_in_ref[...], preferred_element_type=jnp.float32
            ).astype(jnp.bfloat16)

        acc_ref[...] += jnp.dot(
            a_ref[...], rhs_tile, preferred_element_type=jnp.float32
        )

        @pl.when(k == pl.num_programs(1) - 1)
        def _():
            z = acc_ref[...] + b_ref[...]                       # f32 epilogue
            if mode == "relu":
                h = jnp.maximum(z, 0.0)
                if has_w_out:
                    # Fused next-layer feature transform: emit H @ W2 so H
                    # never round-trips through HBM.
                    o_ref[...] = jnp.dot(
                        h.astype(jnp.bfloat16), w_out_ref[...],
                        preferred_element_type=jnp.float32,
                    ).astype(o_ref.dtype)
                else:
                    o_ref[...] = h.astype(o_ref.dtype)
            else:  # masked log_softmax over lanes [0, valid_cols)
                col = jax.lax.broadcasted_iota(jnp.int32, z.shape, 1)
                valid = col < valid_cols
                zm = jnp.where(valid, z, -jnp.inf)
                m = jnp.max(zm, axis=1, keepdims=True)
                e = jnp.where(valid, jnp.exp(zm - m), 0.0)
                lse = jnp.log(jnp.sum(e, axis=1, keepdims=True)) + m
                o_ref[...] = (z - lse).astype(o_ref.dtype)

    return kernel


def _agg_layer(a, rhs, bias, *, w_in=None, w_out=None, mode, valid_cols=0,
               out_dtype, tm, tk):
    """out = epi(A @ (rhs [@ W_in]) + bias) [@ W_out], K-tiled over A columns."""
    n_pad = a.shape[0]
    f_rhs = rhs.shape[1]
    has_w_in = w_in is not None
    has_w_out = w_out is not None
    f_acc = w_in.shape[1] if has_w_in else f_rhs
    f_out = w_out.shape[1] if has_w_out else f_acc
    num_k = n_pad // tk
    out_itemsize = jnp.dtype(out_dtype).itemsize

    # --- explicit VMEM budget (count 2 buffers per auto-DMA'd operand) ---
    def footprint(resident):
        fp = 2 * tm * tk * 2                                    # A stream
        fp += (2 * n_pad * f_rhs * 2) if resident else (2 * tk * f_rhs * 2)
        if has_w_in:
            fp += 2 * w_in.size * 2
        fp += 2 * bias.size * 4
        if has_w_out:
            fp += 2 * w_out.size * 2
        fp += tm * f_acc * 4                                    # f32 acc
        fp += 2 * tm * f_out * out_itemsize                     # output
        return fp

    rhs_resident = (
        num_k > 1
        and 2 * n_pad * f_rhs * 2 <= _RESIDENT_RHS_BUDGET
        and footprint(True) <= _VMEM_LIMIT_CAP
    )
    vmem_limit = int(min(max(32 * _MIB, int(footprint(rhs_resident) * 1.3)),
                         _VMEM_LIMIT_CAP))

    in_specs = [pl.BlockSpec((tm, tk), lambda i, k: (i, k))]
    args = [a]
    if rhs_resident:
        in_specs.append(pl.BlockSpec((n_pad, f_rhs), lambda i, k: (0, 0)))
    else:
        in_specs.append(pl.BlockSpec((tk, f_rhs), lambda i, k: (k, 0)))
    args.append(rhs)
    if has_w_in:
        in_specs.append(pl.BlockSpec(w_in.shape, lambda i, k: (0, 0)))
        args.append(w_in)
    in_specs.append(pl.BlockSpec(bias.shape, lambda i, k: (0, 0)))
    args.append(bias)
    if has_w_out:
        in_specs.append(pl.BlockSpec(w_out.shape, lambda i, k: (0, 0)))
        args.append(w_out)

    kernel = _make_agg_kernel(
        mode=mode, valid_cols=valid_cols, has_w_in=has_w_in,
        has_w_out=has_w_out, rhs_resident=rhs_resident, tk=tk)

    flops = 2 * n_pad * n_pad * f_acc
    if has_w_in:
        flops += 2 * (n_pad // tm) * n_pad * f_rhs * f_acc      # fused X@W1
    if has_w_out:
        flops += 2 * n_pad * f_acc * f_out                      # fused H@W2
    bytes_accessed = (2 * a.size + 2 * rhs.size + 4 * bias.size
                      + (2 * w_in.size if has_w_in else 0)
                      + (2 * w_out.size if has_w_out else 0)
                      + n_pad * f_out * out_itemsize)

    return pl.pallas_call(
        kernel,
        out_shape=jax.ShapeDtypeStruct((n_pad, f_out), out_dtype),
        grid_spec=pltpu.PrefetchScalarGridSpec(
            num_scalar_prefetch=0,
            grid=(n_pad // tm, num_k),                # reduction axis last
            in_specs=in_specs,
            out_specs=pl.BlockSpec((tm, f_out), lambda i, k: (i, 0)),
            scratch_shapes=[pltpu.VMEM((tm, f_acc), jnp.float32)],
        ),
        compiler_params=pltpu.CompilerParams(
            dimension_semantics=("parallel", "arbitrary"),
            vmem_limit_bytes=vmem_limit,
        ),
        cost_estimate=pl.CostEstimate(
            flops=flops,
            transcendentals=n_pad * f_out if mode == "log_softmax" else 0,
            bytes_accessed=bytes_accessed,
        ),
    )(*args)


# ------------------------------ forward --------------------------------------
def gcn_forward(x, edge_index, w1, b1, w2, b2):
    """x: [N, in_dim] f32, edge_index: [2, E] int32 (src, dst)."""
    n, in_dim = x.shape
    hid = w1.shape[1]
    out_dim = w2.shape[1]

    n_pad, tm, tk = _choose_tiles(n)
    in_pad = _round_up(in_dim, _LANE)
    hid_pad = _round_up(hid, _LANE)
    out_pad = _round_up(out_dim, _LANE)

    # --- glue: A_hat built directly at padded size (single pass over A) ---
    a = jnp.zeros((n_pad, n_pad), jnp.float32)
    a = a.at[edge_index[1], edge_index[0]].set(1.0)    # messages src -> dst
    diag = jnp.arange(n)
    a = a.at[diag, diag].add(1.0)                      # self-loops (real rows)
    deg = jnp.sum(a, axis=1)
    d_inv_sqrt = jnp.where(deg > 0, jax.lax.rsqrt(deg), 0.0)
    a_p = (d_inv_sqrt[:, None] * a * d_inv_sqrt[None, :]).astype(jnp.bfloat16)

    x_p = jnp.zeros((n_pad, in_pad), jnp.bfloat16).at[:n, :in_dim].set(
        x.astype(jnp.bfloat16))
    w1_p = jnp.zeros((in_pad, hid_pad), jnp.bfloat16).at[:in_dim, :hid].set(
        w1.astype(jnp.bfloat16))
    b1_p = jnp.zeros((1, hid_pad), jnp.float32).at[0, :hid].set(b1)
    w2_p = jnp.zeros((hid_pad, out_pad), jnp.bfloat16).at[:hid, :out_dim].set(
        w2.astype(jnp.bfloat16))
    b2_p = jnp.zeros((1, out_pad), jnp.float32).at[0, :out_dim].set(b2)

    # --- layer 1: HW2 = relu(A @ (X @ W1) + b1) @ W2 (fully fused) ---
    if in_pad <= 1024:
        hw2 = _agg_layer(a_p, x_p, b1_p, w_in=w1_p, w_out=w2_p, mode="relu",
                         out_dtype=jnp.bfloat16, tm=tm, tk=tk)
    else:
        # Very wide features: per-row-tile recompute of X@W1 stops being free,
        # so do one big-tile feature transform and keep only the W2 fusion.
        xw1 = _feature_transform(x_p, w1_p)
        hw2 = _agg_layer(a_p, xw1, b1_p, w_out=w2_p, mode="relu",
                         out_dtype=jnp.bfloat16, tm=tm, tk=tk)

    # --- layer 2: log_softmax(A @ HW2 + b2) over the real class columns ---
    z = _agg_layer(a_p, hw2, b2_p, mode="log_softmax", valid_cols=out_dim,
                   out_dtype=jnp.float32, tm=tm, tk=tk)

    return z[:n, :out_dim]


# ------------------------------- demo ----------------------------------------
if __name__ == "__main__":
    N, IN_DIM, HID_DIM, OUT_DIM, E = 8, 16, 32, 8, 24

    key = jax.random.PRNGKey(0)
    k_x, k_e1, k_e2, k_w1, k_b1, k_w2, k_b2 = jax.random.split(key, 7)

    x = jax.random.normal(k_x, (N, IN_DIM), dtype=jnp.float32)
    src = jax.random.randint(k_e1, (E,), 0, N, dtype=jnp.int32)
    dst = jax.random.randint(k_e2, (E,), 0, N, dtype=jnp.int32)
    edge_index = jnp.stack([src, dst], axis=0)

    # deterministic parameter init (Glorot-ish scale)
    w1 = jax.random.normal(k_w1, (IN_DIM, HID_DIM), dtype=jnp.float32) * 0.1
    b1 = jax.random.normal(k_b1, (HID_DIM,), dtype=jnp.float32) * 0.01
    w2 = jax.random.normal(k_w2, (HID_DIM, OUT_DIM), dtype=jnp.float32) * 0.1
    b2 = jax.random.normal(k_b2, (OUT_DIM,), dtype=jnp.float32) * 0.01

    out = gcn_forward(x, edge_index, w1, b1, w2, b2)
    out = jax.block_until_ready(out)
    assert out.shape == (N, OUT_DIM)

    # pure-JAX f32 reference (bf16 MXU inputs -> loose tolerance)
    a = jnp.zeros((N, N), jnp.float32).at[edge_index[1], edge_index[0]].set(1.0)
    a = a + jnp.eye(N, dtype=jnp.float32)
    dis = jnp.where(a.sum(1) > 0, 1.0 / jnp.sqrt(a.sum(1)), 0.0)
    a_hat = dis[:, None] * a * dis[None, :]
    h = jnp.maximum(a_hat @ (x @ w1) + b1, 0.0)
    z_ref = a_hat @ (h @ w2) + b2
    ref = jax.nn.log_softmax(z_ref, axis=1)

    max_err = float(jnp.max(jnp.abs(out - ref)))
    assert jnp.allclose(out, ref, atol=5e-2, rtol=5e-2), f"max abs err {max_err}"

    print("KERNEL_OK")
</pallas_src>

<mosaic_0001>
module attributes {stable_mosaic.version = 11 : i64} {
  func.func @kernel(%arg0: i32, %arg1: i32, %arg2: memref<128x128xbf16, #tpu.memory_space<vmem>>, %arg3: memref<128x128xbf16, #tpu.memory_space<vmem>>, %arg4: memref<128x128xbf16, #tpu.memory_space<vmem>>, %arg5: memref<1x128xf32, #tpu.memory_space<vmem>>, %arg6: memref<128x128xbf16, #tpu.memory_space<vmem>>, %arg7: memref<128x128xbf16, #tpu.memory_space<vmem>>, %arg8: memref<128x128xf32, #tpu.memory_space<vmem>>) attributes {dimension_semantics = [#tpu.dimension_semantics<parallel>, #tpu.dimension_semantics<arbitrary>], iteration_bounds = array<i64: 1, 1>, scalar_prefetch = 0 : i64, scratch_operands = 1 : i64, tpu.core_type = #tpu.core_type<tc>, window_params = [{transform_indices = @transform_0, window_bounds = array<i64: 128, 128>}, {transform_indices = @transform_1, window_bounds = array<i64: 128, 128>}, {pipeline_mode = #tpu.pipeline_mode<synchronous>, transform_indices = @transform_2, window_bounds = array<i64: 128, 128>}, {pipeline_mode = #tpu.pipeline_mode<synchronous>, transform_indices = @transform_3, window_bounds = array<i64: 1, 128>}, {pipeline_mode = #tpu.pipeline_mode<synchronous>, transform_indices = @transform_4, window_bounds = array<i64: 128, 128>}, {transform_indices = @transform_5, window_bounds = array<i64: 128, 128>}]} {
    %c0_i32 = arith.constant 0 : i32
    %0 = arith.cmpi eq, %arg1, %c0_i32 : i32
    %1 = arith.extui %0 : i1 to i32
    %c0_i32_0 = arith.constant 0 : i32
    %2 = arith.cmpi ne, %1, %c0_i32_0 : i32
    scf.if %2 {
      %cst_13 = arith.constant 0.000000e+00 : f32
      %15 = vector.broadcast %cst_13 : f32 to vector<128x128xf32>
      %c0_14 = arith.constant 0 : index
      %c0_15 = arith.constant 0 : index
      %16 = vector.load %arg8[%c0_14, %c0_15] : memref<128x128xf32, #tpu.memory_space<vmem>>, vector<128x128xf32>
      tpu.vector_store %arg8[%c0_14, %c0_15], %15 {strides = array<i32>} : memref<128x128xf32, #tpu.memory_space<vmem>>, vector<128x128xf32>,
    } else {
    }
    %c0 = arith.constant 0 : index
    %c0_1 = arith.constant 0 : index
    %3 = vector.load %arg3[%c0, %c0_1] : memref<128x128xbf16, #tpu.memory_space<vmem>>, vector<128x128xbf16>
    %c0_2 = arith.constant 0 : index
    %c0_3 = arith.constant 0 : index
    %4 = vector.load %arg4[%c0_2, %c0_3] : memref<128x128xbf16, #tpu.memory_space<vmem>>, vector<128x128xbf16>
    %cst = arith.constant dense<0.000000e+00> : vector<128x128xf32>
    %5 = tpu.matmul %3, %4, %cst {dimension_numbers = #tpu.dot_dimension_numbers<[1], [0], [0], [1], [0, 0, 1, 1], [], []>} : vector<128x128xbf16>, vector<128x128xbf16>, vector<128x128xf32> -> vector<128x128xf32>
    %6 = arith.truncf %5 : vector<128x128xf32> to vector<128x128xbf16>
    %c0_4 = arith.constant 0 : index
    %c0_5 = arith.constant 0 : index
    %7 = vector.load %arg8[%c0_4, %c0_5] : memref<128x128xf32, #tpu.memory_space<vmem>>, vector<128x128xf32>
    %c0_6 = arith.constant 0 : index
    %c0_7 = arith.constant 0 : index
    %8 = vector.load %arg2[%c0_6, %c0_7] : memref<128x128xbf16, #tpu.memory_space<vmem>>, vector<128x128xbf16>
    %cst_8 = arith.constant dense<0.000000e+00> : vector<128x128xf32>
    %9 = tpu.matmul %8, %6, %cst_8 {dimension_numbers = #tpu.dot_dimension_numbers<[1], [0], [0], [1], [0, 0, 1, 1], [], []>} : vector<128x128xbf16>, vector<128x128xbf16>, vector<128x128xf32> -> vector<128x128xf32>
    %10 = arith.addf %7, %9 : vector<128x128xf32>
    %c0_9 = arith.constant 0 : index
    %c0_10 = arith.constant 0 : index
    %11 = vector.load %arg8[%c0_9, %c0_10] : memref<128x128xf32, #tpu.memory_space<vmem>>, vector<128x128xf32>
    tpu.vector_store %arg8[%c0_9, %c0_10], %10 {strides = array<i32>} : memref<128x128xf32, #tpu.memory_space<vmem>>, vector<128x128xf32>,
    %c0_i32_11 = arith.constant 0 : i32
    %12 = arith.cmpi eq, %arg1, %c0_i32_11 : i32
    %13 = arith.extui %12 : i1 to i32
    %c0_i32_12 = arith.constant 0 : i32
    %14 = arith.cmpi ne, %13, %c0_i32_12 : i32
    scf.if %14 {
      %c0_13 = arith.constant 0 : index
      %c0_14 = arith.constant 0 : index
      %15 = vector.load %arg8[%c0_13, %c0_14] : memref<128x128xf32, #tpu.memory_space<vmem>>, vector<128x128xf32>
      %c0_15 = arith.constant 0 : index
      %c0_16 = arith.constant 0 : index
      %16 = vector.load %arg5[%c0_15, %c0_16] : memref<1x128xf32, #tpu.memory_space<vmem>>, vector<1x128xf32>
      %17 = vector.broadcast %16 : vector<1x128xf32> to vector<128x128xf32>
      %18 = arith.addf %15, %17 : vector<128x128xf32>
      %cst_17 = arith.constant 0.000000e+00 : f32
      %19 = vector.broadcast %cst_17 : f32 to vector<128x128xf32>
      %20 = arith.maximumf %18, %19 : vector<128x128xf32>
      %21 = arith.truncf %20 : vector<128x128xf32> to vector<128x128xbf16>
      %c0_18 = arith.constant 0 : index
      %c0_19 = arith.constant 0 : index
      %22 = vector.load %arg6[%c0_18, %c0_19] : memref<128x128xbf16, #tpu.memory_space<vmem>>, vector<128x128xbf16>
      %cst_20 = arith.constant dense<0.000000e+00> : vector<128x128xf32>
      %23 = tpu.matmul %21, %22, %cst_20 {dimension_numbers = #tpu.dot_dimension_numbers<[1], [0], [0], [1], [0, 0, 1, 1], [], []>} : vector<128x128xbf16>, vector<128x128xbf16>, vector<128x128xf32> -> vector<128x128xf32>
      %24 = arith.truncf %23 : vector<128x128xf32> to vector<128x128xbf16>
      %c0_21 = arith.constant 0 : index
      %c0_22 = arith.constant 0 : index
      %25 = vector.load %arg7[%c0_21, %c0_22] : memref<128x128xbf16, #tpu.memory_space<vmem>>, vector<128x128xbf16>
      tpu.vector_store %arg7[%c0_21, %c0_22], %24 {strides = array<i32>} : memref<128x128xbf16, #tpu.memory_space<vmem>>, vector<128x128xbf16>,
    } else {
    }
    return
  }
  func.func @transform_0(%arg0: i32, %arg1: i32) -> (i32, i32) {
    %c0_i32 = arith.constant 0 : i32
    return %arg0, %arg1 : i32, i32
  }
  func.func @transform_1(%arg0: i32, %arg1: i32) -> (i32, i32) {
    %c0_i32 = arith.constant 0 : i32
    %c0_i32_0 = arith.constant 0 : i32
    return %arg1, %c0_i32 : i32, i32
  }
  func.func @transform_2(%arg0: i32, %arg1: i32) -> (i32, i32) {
    %c0_i32 = arith.constant 0 : i32
    %c0_i32_0 = arith.constant 0 : i32
    %c0_i32_1 = arith.constant 0 : i32
    return %c0_i32, %c0_i32_0 : i32, i32
  }
  func.func @transform_3(%arg0: i32, %arg1: i32) -> (i32, i32) {
    %c0_i32 = arith.constant 0 : i32
    %c0_i32_0 = arith.constant 0 : i32
    %c0_i32_1 = arith.constant 0 : i32
    return %c0_i32, %c0_i32_0 : i32, i32
  }
  func.func @transform_4(%arg0: i32, %arg1: i32) -> (i32, i32) {
    %c0_i32 = arith.constant 0 : i32
    %c0_i32_0 = arith.constant 0 : i32
    %c0_i32_1 = arith.constant 0 : i32
    return %c0_i32, %c0_i32_0 : i32, i32
  }
  func.func @transform_5(%arg0: i32, %arg1: i32) -> (i32, i32) {
    %c0_i32 = arith.constant 0 : i32
    %c0_i32_0 = arith.constant 0 : i32
    return %arg0, %c0_i32 : i32, i32
  }
}

</mosaic_0001>

<bundles_post_ra>
// kernel: tpu_custom_call.1
= control target key start
LH: loop header
LB: loop body
LE: loop exit
PB: predicated region body
PF: predicated region fallthrough
CT: control target
= control target key end

     0   :  { %10 = vsyncpa [#allocation4], 0  ;;  %s1116_s0 = inlined_call_operand.hbm [shape: bf16[128,128], index: 0, kind: input, shape index: {}]   ;;  %s1117_s1 = inlined_call_operand.hbm [shape: bf16[128,128], index: 1, kind: input, shape index: {}]   ;;  %s1118_s2 = inlined_call_operand.hbm [shape: bf16[128,128], index: 2, kind: input, shape index: {}]   ;;  %s1119_s3 = inlined_call_operand.vmem [shape: f32[1,128], index: 3, kind: input, shape index: {}]   ;;  %s1120_s4 = inlined_call_operand.hbm [shape: bf16[128,128], index: 4, kind: input, shape index: {}]   ;;  %s1121_s5 = inlined_call_operand.hbm [shape: bf16[128,128], index: 5, kind: output, shape index: {}]  }
   0x1   :  { %11 = vsyncpa [#allocation7], 0 }
   0x2   :  { %12 = vsyncpa [#allocation10], 0 }
   0x3   :  { %13 = vsyncpa [#allocation5], 0  ;;  %s31_s20 = sshll.u32 %s1117_s1, 4  ;;  %s1046_s21 = smov [#allocation6]   ;;  %s32_s20 = int_to_ptr.hbm [resolvable:$true] %s31_s20 }
   0x4   :  { %s33_s22 = sshll.u32 %s1046_s21, 4  ;;  %s18_s25 = sshll.u32 %s1116_s0, 4  ;;  %s34_s22 = int_to_ptr.vmem [resolvable:$true] %s33_s22  ;;  %s19_s25 = int_to_ptr.hbm [resolvable:$true] %s18_s25 }
   0x5   :  { %s1047_s26 = smov 64   ;;  %s1048_s27 = smov 4  }
   0x6   :  { %39 = dma.hbm_to_vmem [thread:$0]  %s32_s20, 1024, %s34_s22, [#allocation7], %s1047_s26, %s1047_s26, %s1048_s27  }
   0x7   :  { %s1049_s28 = smov [#allocation3]   ;;  %s44_s1 = sshll.u32 %s1118_s2, 4  ;;  %s45_s1 = int_to_ptr.hbm [resolvable:$true] %s44_s1 }
   0x8   :  { %s20_s29 = sshll.u32 %s1049_s28, 4  ;;  %s59_s8 = sshll.u32 %s1120_s4, 4  ;;  %s21_s29 = int_to_ptr.vmem [resolvable:$true] %s20_s29  ;;  %s60_s8 = int_to_ptr.hbm [resolvable:$true] %s59_s8 }
   0x9   :  { %26 = dma.hbm_to_vmem [thread:$0]  %s19_s25, 1024, %s21_s29, [#allocation4], %s1047_s26, %s1047_s26, %s1048_s27  }
   0xa   :  { %s1050_s9 = smov [#allocation8]   ;;  %s1051_s11 = smov [#allocation9]  }
   0xb   :  { %s46_s10 = sshll.u32 %s1050_s9, 4  ;;  %s61_s2 = sshll.u32 %s1051_s11, 4  ;;  %s47_s10 = int_to_ptr.vmem [resolvable:$true] %s46_s10  ;;  %s62_s2 = int_to_ptr.vmem [resolvable:$true] %s61_s2 }
   0xc   :  { %52 = dma.hbm_to_vmem [thread:$0]  %s45_s1, 1024, %s47_s10, [#allocation7], %s1047_s26, %s1047_s26, %s1048_s27  }
   0xd   :  { %67 = dma.hbm_to_vmem [thread:$0]  %s60_s8, 1024, %s62_s2, [#allocation10], %s1047_s26, %s1047_s26, %s1048_s27  }
   0xe   :  { %1038 = dma.done.wait [#allocation4], 1024  }
   0xf   :  { %1039 = vsyncadd [#allocation4], 4294966272 }
  0x10   :  { %1040 = dma.done.wait [#allocation7], 2048  }
  0x11   :  { %1041 = vsyncadd [#allocation7], 4294965248 }
  0x12   :  { %1042 = dma.done.wait [#allocation10], 1024  }
  0x13   :  { %1043 = vsyncadd [#allocation10], 4294966272  ;;  %v822_v0 = vld [vmem:[#allocation8 + $0x38] sm:$0xff]  ;;  %v821_v1 = vld [vmem:[#allocation8 + $0x30] sm:$0xff]  ;;  %s664_s16 = sshll.u32 %s1121_s5, 4  ;;  %s665_s16 = int_to_ptr.hbm [resolvable:$true] %s664_s16 }
  0x14   :  { %232 = vmatpush.bf16.msra.mxu0 %v822_v0  ;;  %886 = vmatpush.bf16.msra.mxu3 %v822_v0  ;;  %v820_v2 = vld [vmem:[#allocation8 + $0x28] sm:$0xff]  ;;  %v819_v3 = vld [vmem:[#allocation8 + $0x20] sm:$0xff]  ;;  %v818_v4 = vld [vmem:[#allocation8 + $0x18] sm:$0xff] }
  0x15   :  { %v817_v5 = vld [vmem:[#allocation8 + $0x10] sm:$0xff]  ;;  %v816_v6 = vld [vmem:[#allocation8 + $0x8] sm:$0xff]  ;;  %v815_v7 = vld [vmem:[#allocation8] sm:$0xff] }
  0x16   :  { %v807_v8 = vld [vmem:[#allocation6] sm:$0xff]  ;;  %v813_v9 = vld [vmem:[#allocation6 + $0x30] sm:$0xff]  ;;  %v808_v10 = vld [vmem:[#allocation6 + $0x8] sm:$0xff] }
  0x17   :  { %v814_v11 = vld [vmem:[#allocation6 + $0x38] sm:$0xff]  ;;  %v809_v12 = vld [vmem:[#allocation6 + $0x10] sm:$0xff]  ;;  %v811_v14 = vld [vmem:[#allocation6 + $0x20] sm:$0xff] }
  0x18   :  { %233 = vmatpush.bf16.msra.mxu0 %v821_v1  ;;  %887 = vmatpush.bf16.msra.mxu3 %v821_v1  ;;  %v810_v13 = vld [vmem:[#allocation6 + $0x18] sm:$0xff]  ;;  %v812_v15 = vld [vmem:[#allocation6 + $0x28] sm:$0xff]  ;;  %v823_v40 = vld [vmem:[#allocation3] sm:$0xff] }
  0x19   :  { %v829_v41 = vld [vmem:[#allocation3 + $0x30] sm:$0xff]  ;;  %v824_v42 = vld [vmem:[#allocation3 + $0x8] sm:$0xff]  ;;  %v830_v43 = vld [vmem:[#allocation3 + $0x38] sm:$0xff] }
  0x1a   :  { %v825_v44 = vld [vmem:[#allocation3 + $0x10] sm:$0xff]  ;;  %v826_v45 = vld [vmem:[#allocation3 + $0x18] sm:$0xff]  ;;  %v836_v48 = vld [vmem:[#allocation9 + $0x28] sm:$0xff] }
  0x1b   :  { %v838_v46 = vld [vmem:[#allocation9 + $0x38] sm:$0xff]  ;;  %v837_v47 = vld [vmem:[#allocation9 + $0x30] sm:$0xff]  ;;  %v835_v49 = vld [vmem:[#allocation9 + $0x20] sm:$0xff] }
  0x1c   :  { %234 = vmatpush.bf16.msra.mxu0 %v820_v2  ;;  %888 = vmatpush.bf16.msra.mxu3 %v820_v2  ;;  %v827_v50 = vld [vmem:[#allocation3 + $0x20] sm:$0xff]  ;;  %v828_v51 = vld [vmem:[#allocation3 + $0x28] sm:$0xff]  ;;  %v834_v52 = vld [vmem:[#allocation9 + $0x18] sm:$0xff] }
  0x1d   :  { %577 = vmatpush.bf16.msra.mxu2 %v838_v46  ;;  %v833_v53 = vld [vmem:[#allocation9 + $0x10] sm:$0xff]  ;;  %v832_v54 = vld [vmem:[#allocation9 + $0x8] sm:$0xff]  ;;  %v831_v55 = vld [vmem:[#allocation9] sm:$0xff] }
  0x1e   :  { %v917_v57 = vld [vmem:[%s1119_s3] ss:$0 sm:$0xff]  ;;  %s1052_s3 = smov [#allocation11]  }
  0x1f   :  { %s662_s13 = sshll.u32 %s1052_s3, 4  ;;  %s663_s13 = int_to_ptr.vmem [resolvable:$true] %s662_s13 }
  0x20   :  { %235 = vmatpush.bf16.msra.mxu0 %v819_v3  ;;  %889 = vmatpush.bf16.msra.mxu3 %v819_v3 }
  0x21   :  { %578 = vmatpush.bf16.msra.mxu2 %v837_v47 }
  0x24   :  { %236 = vmatpush.bf16.msra.mxu0 %v818_v4  ;;  %890 = vmatpush.bf16.msra.mxu3 %v818_v4 }
  0x25   :  { %579 = vmatpush.bf16.msra.mxu2 %v836_v48 }
  0x28   :  { %237 = vmatpush.bf16.msra.mxu0 %v817_v5  ;;  %891 = vmatpush.bf16.msra.mxu3 %v817_v5 }
  0x29   :  { %580 = vmatpush.bf16.msra.mxu2 %v835_v49 }
  0x2c   :  { %238 = vmatpush.bf16.msra.mxu0 %v816_v6  ;;  %892 = vmatpush.bf16.msra.mxu3 %v816_v6 }
  0x2d   :  { %581 = vmatpush.bf16.msra.mxu2 %v834_v52 }
  0x30   :  { %239 = vmatpush.bf16.msra.mxu0 %v815_v7  ;;  %893 = vmatpush.bf16.msra.mxu3 %v815_v7 }
  0x31   :  { %582 = vmatpush.bf16.msra.mxu2 %v833_v53 }
  0x33   :  { %240 = vmatmul.bf16.vlgmr.msra.gmra.mxu0 %v807_v8  ;;  %270 = vmatmul.bf16.vlgmr.msra.gmra.mxu3 %v813_v9 }
  0x35   :  { %583 = vmatpush.bf16.msra.mxu2 %v832_v54 }
  0x39   :  { %584 = vmatpush.bf16.msra.mxu2 %v831_v55 }
  0x43   :  { %245 = vmatmul.bf16.gmra.mxu0 %v808_v10  ;;  %275 = vmatmul.bf16.gmra.mxu3 %v814_v11 }
  0x53   :  { %250 = vmatmul.bf16.gmra.mxu0 %v809_v12 }
  0x63   :  { %255 = vmatmul.bf16.gmra.mxu0 %v810_v13 }
  0x73   :  { %260 = vmatmul.bf16.gmra.mxu0 %v811_v14 }
  0x83   :  { %265 = vmatmul.bf16.gmra.mxu0 %v812_v15 }
  0xb0   :  { %v241_v16 = vpop.f32.mrf.mxu0 }
  0xb6   :  { %v271_v17 = vpop.f32.mrf.mxu3 }
  0xb8   :  { %v243_v18 = vpop.f32.mrf.mxu0 }
  0xb9   :  { %v281_v19 = vpack.c.bf16 %v243_v18, %v241_v16 }
  0xbe   :  { %v273_v20 = vpop.f32.mrf.mxu3 }
  0xbf   :  { %v287_v28 = vpack.c.bf16 %v273_v20, %v271_v17 }
  0xc0   :  { %v246_v21 = vpop.f32.mrf.mxu0 }
  0xc6   :  { %v276_v22 = vpop.f32.mrf.mxu3 }
  0xc8   :  { %v248_v23 = vpop.f32.mrf.mxu0 }
  0xc9   :  { %v282_v24 = vpack.c.bf16 %v248_v23, %v246_v21 }
  0xce   :  { %v278_v25 = vpop.f32.mrf.mxu3 }
  0xcf   :  { %v288_v26 = vpack.c.bf16 %v278_v25, %v276_v22 }
  0xd0   :  { %v251_v27 = vpop.f32.mrf.mxu0 }
  0xd1   :  { %369 = vmatpush.bf16.msra.mxu1 %v288_v26  ;;  %894 = vmatpush.bf16.msrb.mxu3 %v288_v26 }
  0xd5   :  { %370 = vmatpush.bf16.msra.mxu1 %v287_v28  ;;  %895 = vmatpush.bf16.msrb.mxu3 %v287_v28 }
  0xd8   :  { %v253_v29 = vpop.f32.mrf.mxu0 }
  0xd9   :  { %v283_v39 = vpack.c.bf16 %v253_v29, %v251_v27 }
  0xe0   :  { %v256_v30 = vpop.f32.mrf.mxu0 }
  0xe8   :  { %v258_v31 = vpop.f32.mrf.mxu0 }
  0xe9   :  { %v284_v38 = vpack.c.bf16 %v258_v31, %v256_v30 }
  0xf0   :  { %v261_v32 = vpop.f32.mrf.mxu0 }
  0xf8   :  { %v263_v33 = vpop.f32.mrf.mxu0 }
  0xf9   :  { %v285_v37 = vpack.c.bf16 %v263_v33, %v261_v32 }
 0x100   :  { %v266_v34 = vpop.f32.mrf.mxu0 }
 0x108   :  { %v268_v35 = vpop.f32.mrf.mxu0 }
 0x109   :  { %v286_v36 = vpack.c.bf16 %v268_v35, %v266_v34 }
 0x10b   :  { %371 = vmatpush.bf16.msra.mxu1 %v286_v36  ;;  %896 = vmatpush.bf16.msrb.mxu3 %v286_v36 }
 0x10f   :  { %372 = vmatpush.bf16.msra.mxu1 %v285_v37  ;;  %897 = vmatpush.bf16.msrb.mxu3 %v285_v37 }
 0x113   :  { %373 = vmatpush.bf16.msra.mxu1 %v284_v38  ;;  %898 = vmatpush.bf16.msrb.mxu3 %v284_v38 }
 0x117   :  { %374 = vmatpush.bf16.msra.mxu1 %v283_v39  ;;  %899 = vmatpush.bf16.msrb.mxu3 %v283_v39 }
 0x11b   :  { %375 = vmatpush.bf16.msra.mxu1 %v282_v24  ;;  %900 = vmatpush.bf16.msrb.mxu3 %v282_v24 }
 0x11f   :  { %376 = vmatpush.bf16.msra.mxu1 %v281_v19  ;;  %901 = vmatpush.bf16.msrb.mxu3 %v281_v19 }
 0x122   :  { %377 = vmatmul.bf16.vlgmr.msra.gmra.mxu1 %v823_v40  ;;  %407 = vmatmul.bf16.vlgmr.msrb.gmra.mxu3 %v829_v41 }
 0x123   :  { %902 = vmatpush.bf16.msra.mxu3 %v838_v46 }
 0x127   :  { %903 = vmatpush.bf16.msra.mxu3 %v837_v47 }
 0x12b   :  { %904 = vmatpush.bf16.msra.mxu3 %v836_v48 }
 0x12f   :  { %905 = vmatpush.bf16.msra.mxu3 %v835_v49 }
 0x132   :  { %382 = vmatmul.bf16.gmra.mxu1 %v824_v42  ;;  %412 = vmatmul.bf16.gmra.mxu3 %v830_v43 }
 0x133   :  { %906 = vmatpush.bf16.msra.mxu3 %v834_v52 }
 0x137   :  { %907 = vmatpush.bf16.msra.mxu3 %v833_v53 }
 0x13b   :  { %908 = vmatpush.bf16.msra.mxu3 %v832_v54 }
 0x13f   :  { %909 = vmatpush.bf16.msra.mxu3 %v831_v55 }
 0x142   :  { %387 = vmatmul.bf16.gmra.mxu1 %v825_v44 }
 0x152   :  { %392 = vmatmul.bf16.gmra.mxu1 %v826_v45 }
 0x162   :  { %397 = vmatmul.bf16.gmra.mxu1 %v827_v50 }
 0x172   :  { %402 = vmatmul.bf16.gmra.mxu1 %v828_v51 }
 0x19f   :  { %v378_v56 = vpop.f32.mrf.mxu1 }
 0x1a0   :  { %v473_v58 = vadd.f32 %v917_v57, %v378_v56 }
 0x1a2   :  { %v489_v61 = vmax.f32 %v473_v58, 0.0 }
 0x1a5   :  { %v408_v1 = vpop.f32.mrf.mxu3 }
 0x1a6   :  { %v485_v2 = vadd.f32 %v917_v57, %v408_v1 }
 0x1a7   :  { %v380_v59 = vpop.f32.mrf.mxu1 }
 0x1a8   :  { %v474_v60 = vadd.f32 %v917_v57, %v380_v59  ;;  %v501_v7 = vmax.f32 %v485_v2, 0.0 }
 0x1aa   :  { %v490_v62 = vmax.f32 %v474_v60, 0.0 }
 0x1ac   :  { %v505_v63 = vpack.c.bf16 %v490_v62, %v489_v61 }
 0x1ad   :  { %v410_v5 = vpop.f32.mrf.mxu3 }
 0x1ae   :  { %585 = vmatmul.bf16.vlgmr.msra.gmra.mxu2 %v505_v63  ;;  %v486_v8 = vadd.f32 %v917_v57, %v410_v5 }
 0x1af   :  { %v383_v0 = vpop.f32.mrf.mxu1 }
 0x1b0   :  { %v475_v3 = vadd.f32 %v917_v57, %v383_v0  ;;  %v502_v11 = vmax.f32 %v486_v8, 0.0 }
 0x1b2   :  { %v491_v9 = vmax.f32 %v475_v3, 0.0  ;;  %v511_v13 = vpack.c.bf16 %v502_v11, %v501_v7 }
 0x1b4   :  { %615 = vmatmul.bf16.vlgmr.msra.gmra.mxu3 %v511_v13 }
 0x1b5   :  { %v413_v15 = vpop.f32.mrf.mxu3 }
 0x1b6   :  { %v487_v16 = vadd.f32 %v917_v57, %v413_v15 }
 0x1b7   :  { %v385_v4 = vpop.f32.mrf.mxu1 }
 0x1b8   :  { %v476_v6 = vadd.f32 %v917_v57, %v385_v4  ;;  %v503_v21 = vmax.f32 %v487_v16, 0.0 }
 0x1ba   :  { %v492_v10 = vmax.f32 %v476_v6, 0.0 }
 0x1bc   :  { %v506_v12 = vpack.c.bf16 %v492_v10, %v491_v9 }
 0x1bd   :  { %v415_v19 = vpop.f32.mrf.mxu3 }
 0x1be   :  { %590 = vmatmul.bf16.gmra.mxu2 %v506_v12  ;;  %v488_v22 = vadd.f32 %v917_v57, %v415_v19 }
 0x1bf   :  { %v388_v14 = vpop.f32.mrf.mxu1 }
 0x1c0   :  { %v477_v17 = vadd.f32 %v917_v57, %v388_v14  ;;  %v504_v25 = vmax.f32 %v488_v22, 0.0 }
 0x1c2   :  { %v493_v23 = vmax.f32 %v477_v17, 0.0  ;;  %v512_v27 = vpack.c.bf16 %v504_v25, %v503_v21 }
 0x1c4   :  { %620 = vmatmul.bf16.gmra.mxu3 %v512_v27 }
 0x1c7   :  { %v390_v18 = vpop.f32.mrf.mxu1 }
 0x1c8   :  { %v478_v20 = vadd.f32 %v917_v57, %v390_v18 }
 0x1ca   :  { %v494_v24 = vmax.f32 %v478_v20, 0.0 }
 0x1cc   :  { %v507_v26 = vpack.c.bf16 %v494_v24, %v493_v23 }
 0x1ce   :  { %595 = vmatmul.bf16.gmra.mxu2 %v507_v26 }
 0x1cf   :  { %v393_v28 = vpop.f32.mrf.mxu1 }
 0x1d0   :  { %v479_v29 = vadd.f32 %v917_v57, %v393_v28 }
 0x1d2   :  { %v495_v32 = vmax.f32 %v479_v29, 0.0 }
 0x1d7   :  { %v395_v30 = vpop.f32.mrf.mxu1 }
 0x1d8   :  { %v480_v31 = vadd.f32 %v917_v57, %v395_v30 }
 0x1da   :  { %v496_v33 = vmax.f32 %v480_v31, 0.0 }
 0x1dc   :  { %v508_v34 = vpack.c.bf16 %v496_v33, %v495_v32 }
 0x1de   :  { %600 = vmatmul.bf16.gmra.mxu2 %v508_v34 }
 0x1df   :  { %v398_v35 = vpop.f32.mrf.mxu1 }
 0x1e0   :  { %v481_v36 = vadd.f32 %v917_v57, %v398_v35 }
 0x1e2   :  { %v497_v39 = vmax.f32 %v481_v36, 0.0 }
 0x1e7   :  { %v400_v37 = vpop.f32.mrf.mxu1 }
 0x1e8   :  { %v482_v38 = vadd.f32 %v917_v57, %v400_v37 }
 0x1ea   :  { %v498_v40 = vmax.f32 %v482_v38, 0.0 }
 0x1ec   :  { %v509_v41 = vpack.c.bf16 %v498_v40, %v497_v39 }
 0x1ee   :  { %605 = vmatmul.bf16.gmra.mxu2 %v509_v41 }
 0x1ef   :  { %v403_v42 = vpop.f32.mrf.mxu1 }
 0x1f0   :  { %v483_v43 = vadd.f32 %v917_v57, %v403_v42 }
 0x1f2   :  { %v499_v46 = vmax.f32 %v483_v43, 0.0 }
 0x1f7   :  { %v405_v44 = vpop.f32.mrf.mxu1 }
 0x1f8   :  { %v484_v45 = vadd.f32 %v917_v57, %v405_v44 }
 0x1fa   :  { %v500_v47 = vmax.f32 %v484_v45, 0.0 }
 0x1fc   :  { %v510_v48 = vpack.c.bf16 %v500_v47, %v499_v46 }
 0x1fe   :  { %610 = vmatmul.bf16.gmra.mxu2 %v510_v48 }
 0x231   :  { %v586_v49 = vpop.f32.mrf.mxu2 }
 0x237   :  { %v616_v53 = vpop.f32.mrf.mxu3 }
 0x239   :  { %v588_v50 = vpop.f32.mrf.mxu2 }
 0x23a   :  { %v842_v51 = vpack.c.bf16 %v588_v50, %v586_v49 }
 0x23c   :  { %843 = vst [vmem:[#allocation11] sm:$0xff] %v842_v51  }
 0x23f   :  { %v618_v55 = vpop.f32.mrf.mxu3 }
 0x240   :  { %v872_v58 = vpack.c.bf16 %v618_v55, %v616_v53 }
 0x241   :  { %v591_v52 = vpop.f32.mrf.mxu2 }
 0x242   :  { %884 = vst [vmem:[#allocation11 + $0x30] sm:$0xff] %v872_v58  }
 0x247   :  { %v621_v60 = vpop.f32.mrf.mxu3 }
 0x249   :  { %v593_v54 = vpop.f32.mrf.mxu2 }
 0x24a   :  { %v847_v56 = vpack.c.bf16 %v593_v54, %v591_v52 }
 0x24c   :  { %879 = vst [vmem:[#allocation11 + $0x8] sm:$0xff] %v847_v56  }
 0x24f   :  { %v623_v57 = vpop.f32.mrf.mxu3 }
 0x250   :  { %v877_v63 = vpack.c.bf16 %v623_v57, %v621_v60 }
 0x251   :  { %v596_v59 = vpop.f32.mrf.mxu2 }
 0x252   :  { %885 = vst [vmem:[#allocation11 + $0x38] sm:$0xff] %v877_v63  }
 0x259   :  { %v598_v61 = vpop.f32.mrf.mxu2 }
 0x25a   :  { %v852_v62 = vpack.c.bf16 %v598_v61, %v596_v59 }
 0x25c   :  { %880 = vst [vmem:[#allocation11 + $0x10] sm:$0xff] %v852_v62  }
 0x261   :  { %v601_v0 = vpop.f32.mrf.mxu2 }
 0x269   :  { %v603_v1 = vpop.f32.mrf.mxu2 }
 0x26a   :  { %v857_v2 = vpack.c.bf16 %v603_v1, %v601_v0 }
 0x26c   :  { %881 = vst [vmem:[#allocation11 + $0x18] sm:$0xff] %v857_v2  }
 0x271   :  { %v606_v3 = vpop.f32.mrf.mxu2 }
 0x279   :  { %v608_v4 = vpop.f32.mrf.mxu2 }
 0x27a   :  { %v862_v5 = vpack.c.bf16 %v608_v4, %v606_v3 }
 0x27c   :  { %882 = vst [vmem:[#allocation11 + $0x20] sm:$0xff] %v862_v5  }
 0x281   :  { %v611_v6 = vpop.f32.mrf.mxu2 }
 0x289   :  { %v613_v7 = vpop.f32.mrf.mxu2 }
 0x28a   :  { %v867_v8 = vpack.c.bf16 %v613_v7, %v611_v6 }
 0x28c   :  { %883 = vst [vmem:[#allocation11 + $0x28] sm:$0xff] %v867_v8  }
 0x28d   :  { %670 = dma.vmem_to_hbm [thread:$0]  %s663_s13, 1024, %s665_s16, [#allocation5], %s1047_s26, %s1047_s26, %s1048_s27  }
 0x28e   :  { %1044 = dma.done.wait [#allocation5], 1024  }
 0x28f   :  { %1045 = vsyncadd [#allocation5], 4294966272 }
 0x290   :  { %675 = vsyncpa [#allocation4], 1 }
 0x291   :  { %676 = vsyncpa [#allocation7], 1 }
 0x292   :  { %677 = vsyncpa [#allocation10], 1 }
 0x293   :  { %678 = vsyncpa [#allocation5], 1 }

</bundles_post_ra>
